<compile_context>
chip_gen: v7x
topology: tpu7x:2x2x1
jax: 0.10.0
libtpu: 0.0.40
codegen_flags: <defaults>
</compile_context>

<pallas_src>
import jax
import jax.numpy as jnp
from jax.experimental import pallas as pl
from jax.experimental.pallas import tpu as pltpu


def _round_up(x, m):
    return ((x + m - 1) // m) * m


def _pick_tile(n, cap, min_blocks=1):
    """Largest power-of-two tile <= cap that divides n (a multiple of 128) while leaving
    at least `min_blocks` blocks along the axis (v7x needs >=2 blocks on the parallel axis)."""
    t = 128
    for cand in (256, 512, 1024, 2048):
        if cand <= cap and n % cand == 0 and n // cand >= min_blocks:
            t = cand
    return t


# --------------------------------------------------------------------------
# Kernel 1a: batched feature transform  XW[r] = X_src_r @ W_r   (hoisted, computed once)
# --------------------------------------------------------------------------

def _xw_kernel(x_ref, w_ref, o_ref):
    o_ref[...] = jnp.dot(x_ref[...], w_ref[...],
                         preferred_element_type=jnp.float32).astype(o_ref.dtype)


def precompute_xw(x_stack, w_stack, compute_dtype=jnp.bfloat16):
    """x_stack: [R, Ns_pad, D]; w_stack: [R, D, D]. Returns bf16 [R, Ns_pad, D]."""
    num_rel, ns_pad, d = x_stack.shape
    tk = _pick_tile(ns_pad, cap=1024)
    return pl.pallas_call(
        _xw_kernel,
        out_shape=jax.ShapeDtypeStruct((num_rel, ns_pad, d), compute_dtype),
        grid_spec=pltpu.PrefetchScalarGridSpec(
            num_scalar_prefetch=0,
            grid=(num_rel, ns_pad // tk),
            in_specs=[
                pl.BlockSpec((None, tk, d), lambda r, k: (r, k, 0)),
                pl.BlockSpec((None, d, d), lambda r, k: (r, 0, 0)),
            ],
            out_specs=pl.BlockSpec((None, tk, d), lambda r, k: (r, k, 0)),
        ),
        compiler_params=pltpu.CompilerParams(
            dimension_semantics=("parallel", "parallel")),
    )(x_stack.astype(compute_dtype), w_stack.astype(compute_dtype))


# --------------------------------------------------------------------------
# Kernel 1b: fused hetero conv  (sum_r A_r @ XW_r) -> ReLU -> post Linear
# --------------------------------------------------------------------------

def _conv_relu_post_kernel(a_ref, xw_ref, wpost_ref, bpost_ref, o_ref, acc_ref):
    r = pl.program_id(1)
    k = pl.program_id(2)

    @pl.when((r == 0) & (k == 0))
    def _():
        acc_ref[...] = jnp.zeros_like(acc_ref)

    # (tm, D) += A_r tile @ XW_r tile   (bf16 operands, f32 accumulation)
    acc_ref[...] += jnp.dot(a_ref[...], xw_ref[...],
                            preferred_element_type=jnp.float32)

    @pl.when((r == pl.num_programs(1) - 1) & (k == pl.num_programs(2) - 1))
    def _():
        h = jnp.maximum(acc_ref[...], 0.0)                       # ReLU
        post = jnp.dot(h, wpost_ref[...],
                       preferred_element_type=jnp.float32) + bpost_ref[...]
        # (tm, 2) -> (2, tm): runs once per dst tile; keeps the HBM output lane-dense.
        o_ref[...] = post.T


def fused_conv_relu_post(a_stack, xw_stack, w_post, b_post):
    """a_stack: [R, Nd_pad, Ns_pad] bf16; xw_stack: [R, Ns_pad, D] bf16.
    Returns post output laid out as [2, Nd_pad] (f32)."""
    num_rel, nd_pad, ns_pad = a_stack.shape
    d = xw_stack.shape[2]

    # >=2 dst-row blocks whenever possible so the v7x megacore grid is actually shared.
    tm = _pick_tile(nd_pad, cap=1024, min_blocks=2 if nd_pad >= 256 else 1)
    tk = _pick_tile(ns_pad, cap=2048)
    grid = (nd_pad // tm, num_rel, ns_pad // tk)

    # VMEM @ tm=1024, tk=2048: A 3x4MiB(bf16) + XW 2x128KiB + acc 128KiB ≈ 12.5 MiB.
    return pl.pallas_call(
        _conv_relu_post_kernel,
        out_shape=jax.ShapeDtypeStruct((2, nd_pad), jnp.float32),
        grid_spec=pltpu.PrefetchScalarGridSpec(
            num_scalar_prefetch=0,
            grid=grid,
            in_specs=[
                # A is the dominant (HBM-bound) stream: 3-deep buffering.
                pl.BlockSpec((None, tm, tk), lambda i, r, k: (r, i, k),
                             pipeline_mode=pl.Buffered(3)),
                pl.BlockSpec((None, tk, d), lambda i, r, k: (r, k, 0)),
                pl.BlockSpec((d, 2), lambda i, r, k: (0, 0)),
                pl.BlockSpec((1, 2), lambda i, r, k: (0, 0)),
            ],
            out_specs=pl.BlockSpec((2, tm), lambda i, r, k: (0, i)),
            scratch_shapes=[pltpu.VMEM((tm, d), jnp.float32)],
        ),
        compiler_params=pltpu.CompilerParams(
            dimension_semantics=("parallel", "arbitrary", "arbitrary"),
            vmem_limit_bytes=32 * 1024 * 1024),
    )(a_stack, xw_stack, w_post, b_post)


# --------------------------------------------------------------------------
# EvolveGCNH weight evolution: TopK pooling summary + batched packed-gate GRU cell.
# Plain XLA by design (perf review: launch-overhead scale, not a perf driver).
# --------------------------------------------------------------------------

def evolve_weights(x_dict, edge_types, conv_params):
    d = conv_params[edge_types[0]]['w'].shape[0]
    xt_l, w_l, wih_l, whh_l, bih_l, bhh_l = [], [], [], [], [], []
    for et in edge_types:
        pr = conv_params[et]
        x = x_dict[et[0]]
        p = pr['p']
        score = x @ p * jax.lax.rsqrt(jnp.sum(p * p) + 1e-16)
        vals, idx = jax.lax.top_k(score, d)            # ratio = in_channels/num_nodes -> k = D
        xt_l.append(x[idx] * jnp.tanh(vals)[:, None])  # [D, D] summary
        w_l.append(pr['w'])
        wih_l.append(pr['wih'])
        whh_l.append(pr['whh'])
        bih_l.append(pr['bih'])
        bhh_l.append(pr['bhh'])

    xt = jnp.stack(xt_l)        # [R, D, D]
    h = jnp.stack(w_l)          # [R, D, D]
    wih = jnp.stack(wih_l)      # [R, D, 3D]
    whh = jnp.stack(whh_l)
    bih = jnp.stack(bih_l)      # [R, 1, 3D]
    bhh = jnp.stack(bhh_l)

    gi = jnp.einsum('rij,rjk->rik', xt, wih) + bih
    gh = jnp.einsum('rij,rjk->rik', h, whh) + bhh
    r = jax.nn.sigmoid(gi[..., :d] + gh[..., :d])
    z = jax.nn.sigmoid(gi[..., d:2 * d] + gh[..., d:2 * d])
    n = jnp.tanh(gi[..., 2 * d:] + r * gh[..., 2 * d:])
    w_new = (1.0 - z) * n + z * h
    return {et: w_new[i] for i, et in enumerate(edge_types)}


# --------------------------------------------------------------------------
# Kernel 2: ComplEx-style triple_dot scoring, all edge types batched, lane-dense,
#           tiled over the edge axis.
# --------------------------------------------------------------------------

def _score_kernel(in_ref, o_ref):
    hr = in_ref[0:1, :]
    hi = in_ref[1:2, :]
    tr = in_ref[2:3, :]
    ti = in_ref[3:4, :]
    rr = in_ref[4:5, :]
    ri = in_ref[5:6, :]
    o_ref[...] = hr * rr * tr + hi * rr * ti + hr * ri * ti - hi * ri * tr


def complex_scores(post_dict, edge_label_index_dict, rel_emb, edge_types):
    rows, sizes = [], []
    for i, et in enumerate(edge_types):
        eli = edge_label_index_dict[et]
        head = post_dict[et[0]][:, eli[0]]          # [2, E]  (re/im on sublanes)
        tail = post_dict[et[2]][:, eli[1]]
        e = eli.shape[1]
        rr = jnp.broadcast_to(rel_emb[i, 0], (e,))
        ri = jnp.broadcast_to(rel_emb[i, 1], (e,))
        rows.append(jnp.stack([head[0], head[1], tail[0], tail[1], rr, ri], axis=0))
        sizes.append(e)

    packed = jnp.concatenate(rows, axis=1)          # [6, E_total]
    e_total = packed.shape[1]
    te = min(2048, _round_up(max(e_total, 1), 128))
    e_pad = _round_up(max(e_total, 1), te)
    packed = jnp.pad(packed, ((0, 2), (0, e_pad - e_total)))   # -> [8, E_pad]

    scores = pl.pallas_call(
        _score_kernel,
        out_shape=jax.ShapeDtypeStruct((1, e_pad), jnp.float32),
        grid_spec=pltpu.PrefetchScalarGridSpec(
            num_scalar_prefetch=0,
            grid=(e_pad // te,),
            in_specs=[pl.BlockSpec((8, te), lambda i: (0, i))],
            out_specs=pl.BlockSpec((1, te), lambda i: (0, i)),
        ),
        compiler_params=pltpu.CompilerParams(dimension_semantics=("parallel",)),
    )(packed)[0]

    out, off = {}, 0
    for et, e in zip(edge_types, sizes):
        out[et] = scores[off:off + e]
        off += e
    return out


# ----------------------------- plain-JAX glue -----------------------------

def build_gcn_adj(edge_index, num_dst, num_src, dtype=jnp.bfloat16):
    """Dense sym-normalized adjacency emitted directly in `dtype` (bf16) so only the
    compute-dtype N^2 array is ever materialized (no separate f32->bf16 HBM pass)."""
    src, dst = edge_index[0], edge_index[1]
    a = jnp.zeros((num_dst, num_src), jnp.float32).at[dst, src].add(1.0)
    if num_dst == num_src:
        a = a + jnp.eye(num_dst, dtype=jnp.float32)           # self loops
        deg = a.sum(axis=1)
        dinv = jax.lax.rsqrt(jnp.maximum(deg, 1.0))
        return (dinv[:, None] * a * dinv[None, :]).astype(dtype)   # D^-1/2 (A+I) D^-1/2
    # TODO(synk): bipartite gcn_norm convention unspecified; fall back to mean aggregation.
    deg = a.sum(axis=1, keepdims=True)
    return (a / jnp.maximum(deg, 1.0)).astype(dtype)


def rhegcn_forward(params, x_dict, edge_index_dict, edge_label_index_dict, metadata,
                   compute_dtype=jnp.bfloat16):
    node_types, edge_types = metadata

    # 1. EvolveGCNH weight evolution (per edge type) — plain XLA.
    w_evolved = evolve_weights(x_dict, edge_types, params['conv'])

    # 2. HeteroConv(sum) + ReLU + post Linear, fused per destination node type.
    post_dict = {}
    for nt in node_types:
        rels = [et for et in edge_types if et[2] == nt]
        if not rels:
            continue
        n_dst = x_dict[nt].shape[0]
        ns_max = max(x_dict[et[0]].shape[0] for et in rels)
        nd_pad = _round_up(n_dst, 128)
        ns_pad = _round_up(ns_max, 128)

        a_list, x_list, w_list = [], [], []
        for et in rels:
            n_src = x_dict[et[0]].shape[0]
            a = build_gcn_adj(edge_index_dict[et], n_dst, n_src, compute_dtype)
            a_list.append(jnp.pad(a, ((0, nd_pad - n_dst), (0, ns_pad - n_src))))
            x_list.append(jnp.pad(x_dict[et[0]], ((0, ns_pad - n_src), (0, 0))))
            w_list.append(w_evolved[et])

        # Hoisted feature transform: XW[r] = X_src_r @ W_r, computed exactly once.
        xw = precompute_xw(jnp.stack(x_list), jnp.stack(w_list), compute_dtype)

        post = fused_conv_relu_post(jnp.stack(a_list), xw,
                                    params['post']['w'], params['post']['b'])
        post_dict[nt] = post[:, :n_dst]              # [2, N_dst]

    # 3. ComplEx triple_dot scoring, all edge types in one kernel.
    return complex_scores(post_dict, edge_label_index_dict,
                          params['rel_emb'], edge_types)


def init_params(key, in_channels, edge_types):
    d = in_channels
    keys = iter(jax.random.split(key, 4 * len(edge_types) + 3))
    conv = {}
    for et in edge_types:
        conv[et] = {
            'p': jax.random.normal(next(keys), (d,), jnp.float32),
            'w': 0.1 * jax.random.normal(next(keys), (d, d), jnp.float32),
            'wih': 0.1 * jax.random.normal(next(keys), (d, 3 * d), jnp.float32),
            'whh': 0.1 * jax.random.normal(next(keys), (d, 3 * d), jnp.float32),
            'bih': jnp.zeros((1, 3 * d), jnp.float32),
            'bhh': jnp.zeros((1, 3 * d), jnp.float32),
        }
    post = {'w': 0.1 * jax.random.normal(next(keys), (d, 2), jnp.float32),
            'b': jnp.zeros((1, 2), jnp.float32)}
    rel_emb = jax.random.normal(next(keys), (len(edge_types), 2), jnp.float32)
    return {'conv': conv, 'post': post, 'rel_emb': rel_emb}


if __name__ == "__main__":
    key = jax.random.PRNGKey(0)
    N, IN = 200, 32                 # num_nodes, in_channels
    E_MSG, E_LBL = 600, 40          # message edges, label edges (per edge type)
    node_types = ['n']
    edge_types = [('n', 'r0', 'n'), ('n', 'r1', 'n')]
    metadata = (node_types, edge_types)

    kx, kp, ke = jax.random.split(key, 3)
    x_dict = {'n': jax.random.normal(kx, (N, IN), jnp.float32)}
    edge_index_dict = {}
    edge_label_index_dict = {}
    for et in edge_types:
        k1, k2, ke = jax.random.split(ke, 3)
        edge_index_dict[et] = jax.random.randint(k1, (2, E_MSG), 0, N, jnp.int32)
        edge_label_index_dict[et] = jax.random.randint(k2, (2, E_LBL), 0, N, jnp.int32)

    params = init_params(kp, IN, edge_types)

    h_dict = rhegcn_forward(params, x_dict, edge_index_dict,
                            edge_label_index_dict, metadata)
    jax.block_until_ready(h_dict)
    assert all(h_dict[et].shape == (E_LBL,) for et in edge_types)
    print("KERNEL_OK")
</pallas_src>

<mosaic_0001>
module attributes {stable_mosaic.version = 11 : i64} {
  func.func @_xw_kernel(%arg0: i32, %arg1: i32, %arg2: memref<1x256x32xbf16, #tpu.memory_space<vmem>>, %arg3: memref<1x32x32xbf16, #tpu.memory_space<vmem>>, %arg4: memref<1x256x32xbf16, #tpu.memory_space<vmem>>) attributes {dimension_semantics = [#tpu.dimension_semantics<parallel>, #tpu.dimension_semantics<parallel>], iteration_bounds = array<i64: 2, 1>, scalar_prefetch = 0 : i64, scratch_operands = 0 : i64, tpu.core_type = #tpu.core_type<tc>, window_params = [{transform_indices = @transform_0, window_bounds = array<i64: 1, 256, 32>}, {transform_indices = @transform_1, window_bounds = array<i64: 1, 32, 32>}, {transform_indices = @transform_2, window_bounds = array<i64: 1, 256, 32>}]} {
    %c0 = arith.constant 0 : index
    %c0_0 = arith.constant 0 : index
    %c0_1 = arith.constant 0 : index
    %0 = vector.load %arg2[%c0, %c0_0, %c0_1] : memref<1x256x32xbf16, #tpu.memory_space<vmem>>, vector<1x256x32xbf16>
    %1 = vector.shape_cast %0 : vector<1x256x32xbf16> to vector<256x32xbf16>
    %c0_2 = arith.constant 0 : index
    %c0_3 = arith.constant 0 : index
    %c0_4 = arith.constant 0 : index
    %2 = vector.load %arg3[%c0_2, %c0_3, %c0_4] : memref<1x32x32xbf16, #tpu.memory_space<vmem>>, vector<1x32x32xbf16>
    %3 = vector.shape_cast %2 : vector<1x32x32xbf16> to vector<32x32xbf16>
    %cst = arith.constant dense<0.000000e+00> : vector<256x32xf32>
    %4 = tpu.matmul %1, %3, %cst {dimension_numbers = #tpu.dot_dimension_numbers<[1], [0], [0], [1], [0, 0, 1, 1], [], []>} : vector<256x32xbf16>, vector<32x32xbf16>, vector<256x32xf32> -> vector<256x32xf32>
    %5 = arith.truncf %4 : vector<256x32xf32> to vector<256x32xbf16>
    %c0_5 = arith.constant 0 : index
    %c0_6 = arith.constant 0 : index
    %c0_7 = arith.constant 0 : index
    %6 = vector.load %arg4[%c0_5, %c0_6, %c0_7] : memref<1x256x32xbf16, #tpu.memory_space<vmem>>, vector<1x256x32xbf16>
    %7 = vector.shape_cast %6 : vector<1x256x32xbf16> to vector<256x32xbf16>
    %8 = vector.shape_cast %5 : vector<256x32xbf16> to vector<1x256x32xbf16>
    tpu.vector_store %arg4[%c0_5, %c0_6, %c0_7], %8 {strides = array<i32>} : memref<1x256x32xbf16, #tpu.memory_space<vmem>>, vector<1x256x32xbf16>,
    return
  }
  func.func @transform_0(%arg0: i32, %arg1: i32) -> (i32, i32, i32) {
    %c0_i32 = arith.constant 0 : i32
    %c0_i32_0 = arith.constant 0 : i32
    return %arg0, %arg1, %c0_i32 : i32, i32, i32
  }
  func.func @transform_1(%arg0: i32, %arg1: i32) -> (i32, i32, i32) {
    %c0_i32 = arith.constant 0 : i32
    %c0_i32_0 = arith.constant 0 : i32
    %c0_i32_1 = arith.constant 0 : i32
    return %arg0, %c0_i32, %c0_i32_0 : i32, i32, i32
  }
  func.func @transform_2(%arg0: i32, %arg1: i32) -> (i32, i32, i32) {
    %c0_i32 = arith.constant 0 : i32
    %c0_i32_0 = arith.constant 0 : i32
    return %arg0, %arg1, %c0_i32 : i32, i32, i32
  }
}

</mosaic_0001>

<bundles_post_ra>
// kernel: tpu_custom_call.1
= control target key start
LH: loop header
LB: loop body
LE: loop exit
PB: predicated region body
PF: predicated region fallthrough
CT: control target
= control target key end

     0   :  { %s1055_s9 = smov 0   ;;  %s1057_s10 = smov 0   ;;  %s1199_s0 = inlined_call_operand.vmem [shape: bf16[2,256,32], index: 0, kind: input, shape index: {}]   ;;  %s1200_s1 = inlined_call_operand.vmem [shape: bf16[2,32,32], index: 1, kind: input, shape index: {}]   ;;  %s1201_s2 = inlined_call_operand.vmem [shape: bf16[2,256,32], index: 2, kind: output, shape index: {}]  }
   0x1   :  { %s1059_s11 = smov 0  }
   0x2 LB: > { %s24_s12 = sadd.s32 1, %s1034_s10  ;;  %p806_p0 = scmp.ge.s32.totalorder %s1038_s11, 1  ;;  %s1038_s11 = sphi %s1059_s11, %s12_s11   ;;  %s1034_s10 = sphi %s1057_s10, %s1203_s10   ;;  %s1030_s9 = sphi %s1055_s9, %s1202_s9  }
   0x3   : > { %p26_p1 = scmp.ge.s32.totalorder %s24_s12, 2  ;;  %p143_p2 = scmp.lt.s32.totalorder %s1038_s11, 3 }
   0x5   : > { %s1205_s12 = smov (%p26_p1, %s24_s12), 0  ;;  %p144_p3 = pnand %p806_p0, %p143_p2 }
   0x6   : > { %p179_p4 = scmp.lt.s32.totalorder (!%p144_p3), %s1030_s9, 1  ;;  %vm332_vm0 = vcmask (!%p144_p3), 261120   ;;  %vm670_vm1 = vcmask (!%p144_p3), 257024  }
   0x7   : > { %147 = sbr.rel (%p144_p3) target bundleno = 268 (0x10c), region = 28 }
   0xe   : > { %s1207_s9 = smov (!%p179_p4, %s1030_s9), 1 }
   0xf   : > { %s881_s13 = sshll.u32 %s1207_s9, 7  ;;  %s882_s14 = sshll.u32 %s1207_s9, 4 }
  0x10   : > { %s1082_s17 = scalar_lea.vmem %s1199_s0, %s881_s13  ;;  %s192_s20 = scalar_lea.vmem %s1200_s1, %s882_s14 }
  0x11   : > { %v998_v0 = vld [vmem:[%s192_s20] sm:$0xff]   ;;  %v999_v1 = vld [vmem:[%s192_s20 + $0x8] sm:$0xff]   ;;  %v1004_v6 = vld [vmem:[%s1082_s17 + $0x10] sm:$0xff]   ;;  %s1124_s23 = scalar_lea.vmem %s1201_s2, %s881_s13 }
  0x12   : > { %934 = vmatprep.subr.bf16.mxu0 %v998_v0  ;;  %970 = vmatprep.subr.bf16.mxu1 %v998_v0  ;;  %v1000_v2 = vld [vmem:[%s1082_s17] sm:$0xff]   ;;  %v1002_v4 = vld [vmem:[%s1082_s17 + $0x8] sm:$0xff]   ;;  %v1005_v7 = vld [vmem:[%s1082_s17 + $0x50] sm:$0xff]  }
  0x13   : > { %935 = vmatpush3.bf16.msra.mxu0 %v998_v0  ;;  %972 = vmatpush3.bf16.msra.mxu1 %v998_v0  ;;  %v1001_v3 = vld [vmem:[%s1082_s17 + $0x40] sm:$0xff]   ;;  %v1003_v5 = vld [vmem:[%s1082_s17 + $0x48] sm:$0xff]   ;;  %v1006_v8 = vld [vmem:[%s1082_s17 + $0x18] sm:$0xff]  }
  0x14   : > { %936 = vmatprep.subr.bf16.mxu0 %v999_v1  ;;  %971 = vmatprep.subr.bf16.mxu1 %v999_v1  ;;  %v1007_v9 = vld [vmem:[%s1082_s17 + $0x58] sm:$0xff]   ;;  %v1008_v10 = vld [vmem:[%s1082_s17 + $0x20] sm:$0xff]   ;;  %v1010_v12 = vld [vmem:[%s1082_s17 + $0x28] sm:$0xff]  }
  0x15   : > { %938 = vmatprep.mubr.msk.bf16.mxu0 %vm332_vm0, %v1000_v2  ;;  %954 = vmatprep.mubr.msk.bf16.mxu1 %vm332_vm0, %v1001_v3  ;;  %v1009_v11 = vld [vmem:[%s1082_s17 + $0x60] sm:$0xff]   ;;  %v1011_v13 = vld [vmem:[%s1082_s17 + $0x68] sm:$0xff]   ;;  %v1012_v14 = vld [vmem:[%s1082_s17 + $0x30] sm:$0xff]  }
  0x16   : > { %v1013_v15 = vld [vmem:[%s1082_s17 + $0x70] sm:$0xff]   ;;  %v1014_v16 = vld [vmem:[%s1082_s17 + $0x38] sm:$0xff]  }
  0x17   : > { %937 = vmatpush3.bf16.msra.mxu0 %v999_v1  ;;  %973 = vmatpush3.bf16.msra.mxu1 %v999_v1  ;;  %v1015_v17 = vld [vmem:[%s1082_s17 + $0x78] sm:$0xff]  }
  0x1a   : > { %939 = vmatmul.mubr.msk.bf16.vlgmr.msra.gmra.mrb[0].mxu0 %vm332_vm0, %v1002_v4  ;;  %955 = vmatmul.mubr.msk.bf16.vlgmr.msra.gmra.mrb[0].mxu1 %vm332_vm0, %v1003_v5 }
  0x1b   : > { %942 = vmatprep.mubr.msk.bf16.mxu0 %vm332_vm0, %v1004_v6  ;;  %958 = vmatprep.mubr.msk.bf16.mxu1 %vm332_vm0, %v1005_v7 }
  0x22   : > { %943 = vmatmul.mubr.msk.bf16.gmra.mrb[4].mxu0 %vm332_vm0, %v1006_v8  ;;  %959 = vmatmul.mubr.msk.bf16.gmra.mrb[4].mxu1 %vm332_vm0, %v1007_v9 }
  0x23   : > { %946 = vmatprep.mubr.msk.bf16.mxu0 %vm332_vm0, %v1008_v10  ;;  %962 = vmatprep.mubr.msk.bf16.mxu1 %vm332_vm0, %v1009_v11 }
  0x2a   : > { %947 = vmatmul.mubr.msk.bf16.gmra.mrb[8].mxu0 %vm332_vm0, %v1010_v12  ;;  %963 = vmatmul.mubr.msk.bf16.gmra.mrb[8].mxu1 %vm332_vm0, %v1011_v13 }
  0x2b   : > { %950 = vmatprep.mubr.msk.bf16.mxu0 %vm332_vm0, %v1012_v14  ;;  %966 = vmatprep.mubr.msk.bf16.mxu1 %vm332_vm0, %v1013_v15 }
  0x32   : > { %951 = vmatmul.mubr.msk.bf16.gmra.mrb[12].mxu0 %vm332_vm0, %v1014_v16  ;;  %967 = vmatmul.mubr.msk.bf16.gmra.mrb[12].mxu1 %vm332_vm0, %v1015_v17 }
  0xed   : > { %v940_v18 = vpop.f32.mrb[0].mxu0  ;;  %v956_v19 = vpop.f32.mrb[0].mxu1 }
  0xee   : > { %v886_v20 = vpack.c.bf16 %v940_v18, %v940_v18  ;;  %v902_v21 = vpack.c.bf16 %v956_v19, %v956_v19  ;;  %v415_v22 = vpop.f32.mrb[1].mxu0  ;;  %v479_v23 = vpop.f32.mrb[1].mxu1 }
  0xef   : > { %v884_v24 = vpack.c.bf16 %v415_v22, %v415_v22  ;;  %v900_v25 = vpack.c.bf16 %v479_v23, %v479_v23  ;;  %v941_v26 = vpop.f32.mrb[2].mxu0  ;;  %v957_v27 = vpop.f32.mrb[2].mxu1 }
  0xf0   : > { %673 = vst.msk [vmem:[%s1124_s23 + $0x8] sm:$0xf] %vm670_vm1, %v886_v20  ;;  %689 = vst.msk [vmem:[%s1124_s23 + $0x48] sm:$0xf] %vm670_vm1, %v902_v21  ;;  %v887_v28 = vpack.c.bf16 %v941_v26, %v941_v26  ;;  %v903_v29 = vpack.c.bf16 %v957_v27, %v957_v27  ;;  %v418_v30 = vpop.f32.mrb[3].mxu0  ;;  %v482_v31 = vpop.f32.mrb[3].mxu1 }
  0xf1   : > { %671 = vst.msk [vmem:[%s1124_s23] sm:$0xf] %vm670_vm1, %v884_v24  ;;  %687 = vst.msk [vmem:[%s1124_s23 + $0x40] sm:$0xf] %vm670_vm1, %v900_v25  ;;  %v885_v32 = vpack.c.bf16 %v418_v30, %v418_v30  ;;  %v901_v33 = vpack.c.bf16 %v482_v31, %v482_v31 }
  0xf2   : > { %674 = vst.msk [vmem:[%s1124_s23 + $0xc] sm:$0xf] %vm670_vm1, %v887_v28  ;;  %690 = vst.msk [vmem:[%s1124_s23 + $0x4c] sm:$0xf] %vm670_vm1, %v903_v29 }
  0xf3   : > { %672 = vst.msk [vmem:[%s1124_s23 + $0x4] sm:$0xf] %vm670_vm1, %v885_v32  ;;  %688 = vst.msk [vmem:[%s1124_s23 + $0x44] sm:$0xf] %vm670_vm1, %v901_v33 }
  0xf5   : > { %v944_v34 = vpop.f32.mrb[4].mxu0  ;;  %v960_v35 = vpop.f32.mrb[4].mxu1 }
  0xf6   : > { %v890_v36 = vpack.c.bf16 %v944_v34, %v944_v34  ;;  %v906_v37 = vpack.c.bf16 %v960_v35, %v960_v35  ;;  %v431_v38 = vpop.f32.mrb[5].mxu0  ;;  %v495_v39 = vpop.f32.mrb[5].mxu1 }
  0xf7   : > { %v888_v40 = vpack.c.bf16 %v431_v38, %v431_v38  ;;  %v904_v41 = vpack.c.bf16 %v495_v39, %v495_v39  ;;  %v945_v42 = vpop.f32.mrb[6].mxu0  ;;  %v961_v43 = vpop.f32.mrb[6].mxu1 }
  0xf8   : > { %677 = vst.msk [vmem:[%s1124_s23 + $0x18] sm:$0xf] %vm670_vm1, %v890_v36  ;;  %693 = vst.msk [vmem:[%s1124_s23 + $0x58] sm:$0xf] %vm670_vm1, %v906_v37  ;;  %v891_v44 = vpack.c.bf16 %v945_v42, %v945_v42  ;;  %v907_v45 = vpack.c.bf16 %v961_v43, %v961_v43  ;;  %v434_v46 = vpop.f32.mrb[7].mxu0  ;;  %v498_v47 = vpop.f32.mrb[7].mxu1 }
  0xf9   : > { %675 = vst.msk [vmem:[%s1124_s23 + $0x10] sm:$0xf] %vm670_vm1, %v888_v40  ;;  %691 = vst.msk [vmem:[%s1124_s23 + $0x50] sm:$0xf] %vm670_vm1, %v904_v41  ;;  %v889_v48 = vpack.c.bf16 %v434_v46, %v434_v46  ;;  %v905_v49 = vpack.c.bf16 %v498_v47, %v498_v47 }
  0xfa   : > { %678 = vst.msk [vmem:[%s1124_s23 + $0x1c] sm:$0xf] %vm670_vm1, %v891_v44  ;;  %694 = vst.msk [vmem:[%s1124_s23 + $0x5c] sm:$0xf] %vm670_vm1, %v907_v45 }
  0xfb   : > { %676 = vst.msk [vmem:[%s1124_s23 + $0x14] sm:$0xf] %vm670_vm1, %v889_v48  ;;  %692 = vst.msk [vmem:[%s1124_s23 + $0x54] sm:$0xf] %vm670_vm1, %v905_v49 }
  0xfd   : > { %v948_v50 = vpop.f32.mrb[8].mxu0  ;;  %v964_v51 = vpop.f32.mrb[8].mxu1 }
  0xfe   : > { %v894_v52 = vpack.c.bf16 %v948_v50, %v948_v50  ;;  %v910_v53 = vpack.c.bf16 %v964_v51, %v964_v51  ;;  %v447_v54 = vpop.f32.mrb[9].mxu0  ;;  %v511_v55 = vpop.f32.mrb[9].mxu1 }
  0xff   : > { %v892_v56 = vpack.c.bf16 %v447_v54, %v447_v54  ;;  %v908_v57 = vpack.c.bf16 %v511_v55, %v511_v55  ;;  %v949_v58 = vpop.f32.mrb[10].mxu0  ;;  %v965_v59 = vpop.f32.mrb[10].mxu1 }
 0x100   : > { %681 = vst.msk [vmem:[%s1124_s23 + $0x28] sm:$0xf] %vm670_vm1, %v894_v52  ;;  %697 = vst.msk [vmem:[%s1124_s23 + $0x68] sm:$0xf] %vm670_vm1, %v910_v53  ;;  %v895_v60 = vpack.c.bf16 %v949_v58, %v949_v58  ;;  %v911_v61 = vpack.c.bf16 %v965_v59, %v965_v59  ;;  %v450_v62 = vpop.f32.mrb[11].mxu0  ;;  %v514_v63 = vpop.f32.mrb[11].mxu1 }
 0x101   : > { %679 = vst.msk [vmem:[%s1124_s23 + $0x20] sm:$0xf] %vm670_vm1, %v892_v56  ;;  %695 = vst.msk [vmem:[%s1124_s23 + $0x60] sm:$0xf] %vm670_vm1, %v908_v57  ;;  %v893_v0 = vpack.c.bf16 %v450_v62, %v450_v62  ;;  %v909_v1 = vpack.c.bf16 %v514_v63, %v514_v63 }
 0x102   : > { %682 = vst.msk [vmem:[%s1124_s23 + $0x2c] sm:$0xf] %vm670_vm1, %v895_v60  ;;  %698 = vst.msk [vmem:[%s1124_s23 + $0x6c] sm:$0xf] %vm670_vm1, %v911_v61 }
 0x103   : > { %680 = vst.msk [vmem:[%s1124_s23 + $0x24] sm:$0xf] %vm670_vm1, %v893_v0  ;;  %696 = vst.msk [vmem:[%s1124_s23 + $0x64] sm:$0xf] %vm670_vm1, %v909_v1 }
 0x105   : > { %v952_v2 = vpop.f32.mrb[12].mxu0  ;;  %v968_v3 = vpop.f32.mrb[12].mxu1 }
 0x106   : > { %v898_v4 = vpack.c.bf16 %v952_v2, %v952_v2  ;;  %v914_v5 = vpack.c.bf16 %v968_v3, %v968_v3  ;;  %v463_v6 = vpop.f32.mrb[13].mxu0  ;;  %v527_v7 = vpop.f32.mrb[13].mxu1 }
 0x107   : > { %v896_v8 = vpack.c.bf16 %v463_v6, %v463_v6  ;;  %v912_v9 = vpack.c.bf16 %v527_v7, %v527_v7  ;;  %v953_v10 = vpop.f32.mrb[14].mxu0  ;;  %v969_v11 = vpop.f32.mrb[14].mxu1 }
 0x108   : > { %685 = vst.msk [vmem:[%s1124_s23 + $0x38] sm:$0xf] %vm670_vm1, %v898_v4  ;;  %701 = vst.msk [vmem:[%s1124_s23 + $0x78] sm:$0xf] %vm670_vm1, %v914_v5  ;;  %v899_v12 = vpack.c.bf16 %v953_v10, %v953_v10  ;;  %v915_v13 = vpack.c.bf16 %v969_v11, %v969_v11  ;;  %v466_v14 = vpop.f32.mrb[15].mxu0  ;;  %v530_v15 = vpop.f32.mrb[15].mxu1 }
 0x109   : > { %683 = vst.msk [vmem:[%s1124_s23 + $0x30] sm:$0xf] %vm670_vm1, %v896_v8  ;;  %699 = vst.msk [vmem:[%s1124_s23 + $0x70] sm:$0xf] %vm670_vm1, %v912_v9  ;;  %v897_v16 = vpack.c.bf16 %v466_v14, %v466_v14  ;;  %v913_v17 = vpack.c.bf16 %v530_v15, %v530_v15 }
 0x10a   : > { %686 = vst.msk [vmem:[%s1124_s23 + $0x3c] sm:$0xf] %vm670_vm1, %v899_v12  ;;  %702 = vst.msk [vmem:[%s1124_s23 + $0x7c] sm:$0xf] %vm670_vm1, %v915_v13 }
 0x10b   : > { %684 = vst.msk [vmem:[%s1124_s23 + $0x34] sm:$0xf] %vm670_vm1, %v897_v16  ;;  %700 = vst.msk [vmem:[%s1124_s23 + $0x74] sm:$0xf] %vm670_vm1, %v913_v17 }
 0x10c PF: > { %s12_s11 = sadd.s32 1, %s1038_s11   ;;  %s1202_s9 = smov %s1034_s10 }
 0x10d   : > { %p9_p5 = scmp.ge.s32.totalorder %s12_s11, 4   ;;  %s1203_s10 = smov %s1205_s12 }
 0x10f   :  { %11 = sbr.rel (!%p9_p5) target bundleno = 2 (0x2), region = 61 }

</bundles_post_ra>
